<compile_context>
chip_gen: v6e
topology: v6e:2x2x1
jax: 0.10.0
libtpu: 0.0.40
codegen_flags: <defaults>
</compile_context>

<pallas_src>
import functools
import random

import jax
import jax.numpy as jnp
import numpy as np
from jax import lax
from jax.experimental import pallas as pl
from jax.experimental.pallas import tpu as pltpu


def sec2frames(sec, fps):
    return int(sec * fps)


_TARGET_BLOCK_BYTES = 3 << 20   # ~3 MiB output blocks (amortizes per-step cost)
_VMEM_LIMIT_BYTES = 32 << 20    # above v5e/v6e scoped default, <= v7x physical


# ---------------------------------------------------------------------------
# Layout / tiling helpers (dtype-aware).
# ---------------------------------------------------------------------------
def _sublane(itemsize):
    # Sublane granularity: 8 for 32-bit, 16 for 16-bit, 32 for 8-bit dtypes.
    return max(8, 32 // itemsize)


def _frame_layout(C, H, W, itemsize):
    """View one flattened frame (C*H*W elements) as (rows, lane)."""
    chw = C * H * W
    sub = _sublane(itemsize)
    for lane in (512, 256, 128):              # lane-dense + sublane-dense
        if chw % lane == 0 and (chw // lane) % sub == 0:
            return chw // lane, lane
    for lane in (512, 256, 128):              # at least lane-dense
        if chw % lane == 0:
            return chw // lane, lane
    # Fallback: natural (C*H, W) view.  Both dims equal the full array dims,
    # so blocks are always legal (correct, though not lane-dense).
    return C * H, W


def _block_sizing(T, rows, lane, itemsize, target):
    """Pick (frames per block, rows per chunk) so a block is ~`target` bytes."""
    sub = _sublane(itemsize)
    frame_bytes = rows * lane * itemsize
    if frame_bytes > target and rows > sub:
        # Huge frames: one frame per block, chunk rows within the frame.
        fb = 1
        rb = max(sub, (target // (lane * itemsize)) // sub * sub)
        rb = min(rb, rows)
    else:
        # Small/medium frames: coalesce several frames per block.
        rb = rows
        fb = max(1, min(target // frame_bytes, (T + 1) // 2))
        fb = min(fb, T)
    return int(fb), int(rb)


# ---------------------------------------------------------------------------
# Kernel: uniform select on the global frame index.
#   out[t] = src_lo (frame start-1)  if t <  start
#          = src_hi (frame end)      if t >= end
#          = original frame          otherwise
# ---------------------------------------------------------------------------
def _freeze_select_kernel(prm_ref, blk_ref, x_ref, src_ref, o_ref, *, fb):
    i = pl.program_id(1)                       # frame-block axis (innermost)
    start = prm_ref[0]
    end = prm_ref[1]
    # Global frame index of every row of this block along the frame axis.
    t = blk_ref[i] * fb + lax.broadcasted_iota(jnp.int32, o_ref.shape, 0)
    lo = src_ref[0]                            # (rb, lane) = vid[start-1] chunk
    hi = src_ref[1]                            # (rb, lane) = vid[end] chunk
    o_ref[...] = jnp.where(t < start, lo, jnp.where(t >= end, hi, x_ref[...]))


# ---------------------------------------------------------------------------
# Pallas wrapper.
# ---------------------------------------------------------------------------
def freeze_frames_pallas(vid: jax.Array, start: int, end: int, *,
                         target_block_bytes: int = _TARGET_BLOCK_BYTES) -> jax.Array:
    """Apply FreezeFrames semantics to `vid` for active window [start, end)."""
    T, C, H, W = vid.shape
    start = int(max(0, min(start, T)))
    end = int(max(start, min(end, T)))
    if start == 0 and end >= T:                # whole clip active: nothing frozen
        return vid

    itemsize = vid.dtype.itemsize
    rows, lane = _frame_layout(C, H, W, itemsize)
    fb, rb = _block_sizing(T, rows, lane, itemsize, target_block_bytes)
    n_chunks = int(pl.cdiv(rows, rb))
    n_blocks = int(pl.cdiv(T, fb))

    # Frame blocks that contain at least one frozen frame (the rest are
    # untouched thanks to the input/output aliasing).
    blocks = np.arange(n_blocks, dtype=np.int64)
    blk_lo = blocks * fb
    blk_hi = np.minimum(blk_lo + fb, T)
    blk_ids = blocks[(blk_lo < start) | (blk_hi > end)].astype(np.int32)
    if blk_ids.size == 0:
        return vid

    # Block-index range containing active frames: the pass-through input of
    # fully-frozen blocks is clipped into this range (its data is unused, and
    # consecutive equal indices are elided by the pipeline -> ~2 extra reads).
    if end > start:
        act_lo_blk, act_hi_blk = start // fb, (end - 1) // fb
    else:
        act_lo_blk, act_hi_blk = 0, 0

    params = jnp.asarray([start, end, act_lo_blk, act_hi_blk], dtype=jnp.int32)
    blk_ids_j = jnp.asarray(blk_ids)

    v3 = vid.reshape(T, rows, lane)            # lane-dense, layout-only reshape
    # Materialize the two source frames outside the kernel (tiny XLA gather),
    # so the aliased output buffer is never read as a freeze source.
    src_frames = jnp.asarray([max(start - 1, 0), min(end, T - 1)], dtype=jnp.int32)
    srcs = jnp.take(v3, src_frames, axis=0)    # (2, rows, lane)

    block_bytes = fb * rb * lane * itemsize
    grid_spec = pltpu.PrefetchScalarGridSpec(
        num_scalar_prefetch=2,
        # Frame-block axis innermost: src / clipped pass-through reads keep the
        # same block index across consecutive steps and are elided.
        grid=(n_chunks, int(blk_ids.size)),
        in_specs=[
            # Pass-through view of the (aliased) video.
            pl.BlockSpec((fb, rb, lane),
                         lambda c, i, prm, blk: (jnp.clip(blk[i], prm[2], prm[3]), c, 0)),
            # The two freeze-source frames.
            pl.BlockSpec((2, rb, lane), lambda c, i, prm, blk: (0, c, 0)),
        ],
        out_specs=pl.BlockSpec((fb, rb, lane),
                               lambda c, i, prm, blk: (blk[i], c, 0)),
    )

    out = pl.pallas_call(
        functools.partial(_freeze_select_kernel, fb=fb),
        out_shape=jax.ShapeDtypeStruct((T, rows, lane), vid.dtype),
        grid_spec=grid_spec,
        # Flat call args are (params, blk_ids, v3, srcs) -> video is input 2.
        # Aliasing it to output 0 means fully-active blocks are never touched.
        input_output_aliases={2: 0},
        compiler_params=pltpu.CompilerParams(
            dimension_semantics=("parallel", "parallel"),
            vmem_limit_bytes=_VMEM_LIMIT_BYTES),
        cost_estimate=pl.CostEstimate(
            flops=0, transcendentals=0,
            # writes: processed blocks; reads: ~2 pass-through blocks + 2 src
            # frame chunks per chunk (elided across the frame-block axis).
            bytes_accessed=int(n_chunks * (blk_ids.size * block_bytes
                                           + 2 * block_bytes
                                           + 2 * rb * lane * itemsize))),
    )(params, blk_ids_j, v3, srcs)
    return out.reshape(T, C, H, W)


# ---------------------------------------------------------------------------
# Module port.
# ---------------------------------------------------------------------------
class FreezeFrames:
    """JAX/Pallas port of dataset.transforms.FreezeFrames."""

    def __init__(self, max_off_sec, active_min_overlap_sec, to_freeze_frames) -> None:
        self.max_off_sec = max_off_sec
        self.active_min_overlap_sec = active_min_overlap_sec
        self.sec_v_is_active = max_off_sec + active_min_overlap_sec
        self.to_freeze_frames = to_freeze_frames
        if to_freeze_frames:
            print(f'Going to freeze all frames except for {self.sec_v_is_active} sec randomly')

    def __call__(self, item):
        if not self.to_freeze_frames:
            return item
        vid = item['video']
        v_fps = item['meta']['video']['fps'][0]
        v_len_frames = vid.shape[0]
        frames_v_is_active = sec2frames(self.sec_v_is_active, v_fps)
        start_frame = random.randint(0, v_len_frames - frames_v_is_active)
        end_frame = start_frame + frames_v_is_active

        item['video'] = freeze_frames_pallas(vid, start_frame, end_frame)
        item['_debug_window'] = (start_frame, end_frame)
        return item


# ---------------------------------------------------------------------------
# Reference + tests.
# ---------------------------------------------------------------------------
def _reference_numpy(vid_np, start, end):
    T = vid_np.shape[0]
    out = vid_np.copy()
    if start > 0:
        out[:start] = vid_np[start - 1][None]
    if end < T:
        out[end:] = vid_np[end][None]
    return out


def _check(vid_arr, vid_np, s, e, **kw):
    got = jax.block_until_ready(freeze_frames_pallas(vid_arr, s, e, **kw))
    np.testing.assert_array_equal(np.asarray(got), _reference_numpy(vid_np, s, e))


if __name__ == "__main__":
    random.seed(0)
    key = jax.random.PRNGKey(0)
    k1, k2, k3 = jax.random.split(key, 3)

    # Small f32 clip (lane-dense path, fb>1, single mixed block / edge cases).
    T, C, H, W = 8, 4, 16, 16
    vid = jax.random.normal(k1, (T, C, H, W), dtype=jnp.float32)
    vid_np = np.asarray(vid)
    for (s, e) in [(0, 6), (1, 7), (2, 8), (3, 5), (0, 8), (4, 4)]:
        _check(vid, vid_np, s, e)

    # Smaller block budget -> multiple frame blocks: pure-frozen blocks,
    # mixed boundary blocks and clipped pass-through reads all exercised.
    for (s, e) in [(1, 7), (3, 6)]:
        _check(vid, vid_np, s, e, target_block_bytes=32 * 1024)

    # Larger f32 frames -> within-frame chunking path (fb=1, n_chunks>1,
    # partial edge chunk).
    vid2 = jax.random.normal(k2, (5, 3, 64, 64), dtype=jnp.float32)
    _check(vid2, np.asarray(vid2), 2, 4, target_block_bytes=32 * 1024)

    # uint8 video with C*H*W not divisible by 128 -> natural-layout fallback
    # and 8-bit select path.
    vid3 = jax.random.randint(k3, (6, 3, 20, 20), 0, 256, dtype=jnp.int32).astype(jnp.uint8)
    _check(vid3, np.asarray(vid3), 2, 5)

    # Module-level check (host-side RNG, like the torch module).
    item = {'video': vid, 'meta': {'video': {'fps': [4]}}}
    # max_off_sec + active_min_overlap_sec = 1.5 sec -> 6 active frames of 8.
    tfm = FreezeFrames(max_off_sec=1.0, active_min_overlap_sec=0.5,
                       to_freeze_frames=True)
    item = tfm(item)
    out = jax.block_until_ready(item['video'])
    s, e = item['_debug_window']
    np.testing.assert_array_equal(np.asarray(out), _reference_numpy(vid_np, s, e))

    print("KERNEL_OK")
</pallas_src>

<mosaic_0001>
module attributes {stable_mosaic.version = 11 : i64} {
  func.func @_freeze_select_kernel(%arg0: i32, %arg1: i32, %arg2: memref<4xi32, #tpu.memory_space<smem>>, %arg3: memref<1xi32, #tpu.memory_space<smem>>, %arg4: memref<4x8x128xf32, #tpu.memory_space<vmem>>, %arg5: memref<2x8x128xf32, #tpu.memory_space<vmem>>, %arg6: memref<4x8x128xf32, #tpu.memory_space<vmem>>) attributes {dimension_semantics = [#tpu.dimension_semantics<parallel>, #tpu.dimension_semantics<parallel>], iteration_bounds = array<i64: 1, 1>, scalar_prefetch = 2 : i64, scratch_operands = 0 : i64, tpu.core_type = #tpu.core_type<tc>, window_params = [{transform_indices = @transform_0, window_bounds = array<i64: 4, 8, 128>}, {transform_indices = @transform_1, window_bounds = array<i64: 2, 8, 128>}, {transform_indices = @transform_2, window_bounds = array<i64: 4, 8, 128>}]} {
    %c0 = arith.constant 0 : index
    %0 = memref.load %arg2[%c0] : memref<4xi32, #tpu.memory_space<smem>>
    %c1 = arith.constant 1 : index
    %1 = memref.load %arg2[%c1] : memref<4xi32, #tpu.memory_space<smem>>
    %2 = arith.index_cast %arg1 : i32 to index
    %3 = memref.load %arg3[%2] : memref<1xi32, #tpu.memory_space<smem>>
    %c4_i32 = arith.constant 4 : i32
    %4 = arith.muli %3, %c4_i32 : i32
    %5 = tpu.iota {dimensions = array<i32: 0>} : vector<4x8x128xi32>
    %6 = vector.broadcast %4 : i32 to vector<4x8x128xi32>
    %7 = arith.addi %6, %5 : vector<4x8x128xi32>
    %c0_0 = arith.constant 0 : index
    %c0_1 = arith.constant 0 : index
    %c0_2 = arith.constant 0 : index
    %8 = vector.load %arg5[%c0_0, %c0_1, %c0_2] : memref<2x8x128xf32, #tpu.memory_space<vmem>>, vector<1x8x128xf32>
    %9 = vector.shape_cast %8 : vector<1x8x128xf32> to vector<8x128xf32>
    %c1_3 = arith.constant 1 : index
    %c0_4 = arith.constant 0 : index
    %c0_5 = arith.constant 0 : index
    %10 = vector.load %arg5[%c1_3, %c0_4, %c0_5] : memref<2x8x128xf32, #tpu.memory_space<vmem>>, vector<1x8x128xf32>
    %11 = vector.shape_cast %10 : vector<1x8x128xf32> to vector<8x128xf32>
    %12 = vector.broadcast %0 : i32 to vector<4x8x128xi32>
    %13 = arith.cmpi slt, %7, %12 : vector<4x8x128xi32>
    %14 = vector.broadcast %1 : i32 to vector<4x8x128xi32>
    %15 = arith.cmpi sge, %7, %14 : vector<4x8x128xi32>
    %c0_6 = arith.constant 0 : index
    %c0_7 = arith.constant 0 : index
    %c0_8 = arith.constant 0 : index
    %16 = vector.load %arg4[%c0_6, %c0_7, %c0_8] : memref<4x8x128xf32, #tpu.memory_space<vmem>>, vector<4x8x128xf32>
    %17 = vector.shape_cast %11 : vector<8x128xf32> to vector<1x8x128xf32>
    %18 = vector.broadcast %17 : vector<1x8x128xf32> to vector<4x8x128xf32>
    %19 = arith.select %15, %18, %16 : vector<4x8x128xi1>, vector<4x8x128xf32>
    %20 = vector.shape_cast %9 : vector<8x128xf32> to vector<1x8x128xf32>
    %21 = vector.broadcast %20 : vector<1x8x128xf32> to vector<4x8x128xf32>
    %22 = arith.select %13, %21, %19 : vector<4x8x128xi1>, vector<4x8x128xf32>
    %c0_9 = arith.constant 0 : index
    %c0_10 = arith.constant 0 : index
    %c0_11 = arith.constant 0 : index
    %23 = vector.load %arg6[%c0_9, %c0_10, %c0_11] : memref<4x8x128xf32, #tpu.memory_space<vmem>>, vector<4x8x128xf32>
    tpu.vector_store %arg6[%c0_9, %c0_10, %c0_11], %22 {strides = array<i32>} : memref<4x8x128xf32, #tpu.memory_space<vmem>>, vector<4x8x128xf32>,
    return
  }
  func.func @transform_0(%arg0: i32, %arg1: i32, %arg2: memref<4xi32, #tpu.memory_space<smem>>, %arg3: memref<1xi32, #tpu.memory_space<smem>>) -> (i32, i32, i32) {
    %0 = arith.index_cast %arg1 : i32 to index
    %1 = memref.load %arg3[%0] : memref<1xi32, #tpu.memory_space<smem>>
    %c2 = arith.constant 2 : index
    %2 = memref.load %arg2[%c2] : memref<4xi32, #tpu.memory_space<smem>>
    %c3 = arith.constant 3 : index
    %3 = memref.load %arg2[%c3] : memref<4xi32, #tpu.memory_space<smem>>
    %4 = arith.maxsi %2, %1 : i32
    %5 = arith.minsi %3, %4 : i32
    %c0_i32 = arith.constant 0 : i32
    %c0_i32_0 = arith.constant 0 : i32
    return %5, %arg0, %c0_i32 : i32, i32, i32
  }
  func.func @transform_1(%arg0: i32, %arg1: i32, %arg2: memref<4xi32, #tpu.memory_space<smem>>, %arg3: memref<1xi32, #tpu.memory_space<smem>>) -> (i32, i32, i32) {
    %c0_i32 = arith.constant 0 : i32
    %c0_i32_0 = arith.constant 0 : i32
    %c0_i32_1 = arith.constant 0 : i32
    return %c0_i32, %arg0, %c0_i32_0 : i32, i32, i32
  }
  func.func @transform_2(%arg0: i32, %arg1: i32, %arg2: memref<4xi32, #tpu.memory_space<smem>>, %arg3: memref<1xi32, #tpu.memory_space<smem>>) -> (i32, i32, i32) {
    %0 = arith.index_cast %arg1 : i32 to index
    %1 = memref.load %arg3[%0] : memref<1xi32, #tpu.memory_space<smem>>
    %c0_i32 = arith.constant 0 : i32
    %c0_i32_0 = arith.constant 0 : i32
    return %1, %arg0, %c0_i32 : i32, i32, i32
  }
}

</mosaic_0001>

<bundles_post_ra>
// kernel: tpu_custom_call.1
= control target key start
LH: loop header
LB: loop body
LE: loop exit
PB: predicated region body
PF: predicated region fallthrough
CT: control target
= control target key end

     0   :  { %s273_s0 = inlined_call_operand.vmem [shape: s32[4], index: 0, kind: input, shape index: {}]   ;;  %s274_s1 = inlined_call_operand.<no memory space> [shape: s32[1], index: 1, kind: input, shape index: {}]   ;;  %s275_s2 = inlined_call_operand.hbm [shape: f32[8,8,128], index: 2, kind: input, shape index: {}, may-alias: {2,4}]   ;;  %s276_s3 = inlined_call_operand.vmem [shape: f32[2,8,128], index: 3, kind: input, shape index: {}]   ;;  %s277_s4 = inlined_call_operand.hbm [shape: f32[8,8,128], index: 4, kind: output, shape index: {}, may-alias: {2,4}]  }
   0x1   :  { %s9_s17 = sshll.u32 %s273_s0, 4  ;;  %s10_s17 = int_to_ptr.vmem [resolvable:$true] %s9_s17 }
   0x2   :  { %s133_s18 = scalar_lea.vmem %s10_s17, 16  ;;  %p138_p1 = scmp.lt.s32.totalorder %s10_s17, %s10_s17 }
   0x3   :  { %p134_p0 = scmp.ne.s32.totalorder %s10_s17, %s133_s18  ;;  %p139_p2 = scmp.lt.s32.totalorder %s133_s18, %s133_s18 }
   0x5   :  { %p140_p3 = por %p139_p2, %p138_p1 }
   0x7   :  { %p141_p4 = pnand %p140_p3, %p134_p0 }
   0x9   :  { %144 = shalt.err (!%p141_p4)  }
   0xa   :  { %s195_s19 = smov [#allocation3]  }
   0xb   :  { %12 = dma.vmem_to_smem %s10_s17, 16, %s195_s19, [#allocation2] }
   0xc   :  { %189 = dma.done.wait [#allocation2], 16 }
   0xd   :  { %190 = vsyncadd [#allocation2], 4294967280 }
   0xe   :  { %15 = sfence }
   0xf   :  { %16 = vsyncpa [#allocation6], 0 }
  0x10   :  { %17 = vsyncpa [#allocation7], 0  ;;  %s117_s20 = sld [smem:[#allocation3 + $0x2]]  ;;  %s196_s0 = smov [#allocation5]  }
  0x11   :  { %s118_s21 = sld [smem:[#allocation3 + $0x3]]  ;;  %s33_s24 = sshll.u32 %s196_s0, 4  ;;  %s34_s24 = int_to_ptr.vmem [resolvable:$true] %s33_s24 }
  0x12   :  { %s147_s8 = scalar_lea.hbm %s275_s2, 1024 }
  0x16   :  { %p23_p5 = scmp.gt.s32.totalorder %s117_s20, %s274_s1 }
  0x18   :  { %s279_s20 = smov (!%p23_p5, %s117_s20), %s274_s1 }
  0x19   :  { %p25_p6 = scmp.lt.s32.totalorder %s118_s21, %s279_s20 }
  0x1b   :  { %s281_s21 = smov (!%p25_p6, %s118_s21), %s279_s20 }
  0x1c   :  { %s126_s27 = sshll.u32 %s281_s21, 9 }
  0x1d   :  { %s32_s30 = scalar_lea.hbm %s275_s2, %s126_s27 }
  0x1e   :  { %s145_s5 = scalar_lea.hbm %s32_s30, 512  ;;  %p148_p8 = scmp.lt.s32.totalorder %s32_s30, %s275_s2 }
  0x1f   :  { %p146_p7 = scmp.ne.s32.totalorder %s32_s30, %s145_s5  ;;  %p149_p9 = scmp.lt.s32.totalorder %s147_s8, %s145_s5 }
  0x21   :  { %p150_p10 = por %p149_p9, %p148_p8 }
  0x23   :  { %p151_p11 = pnand %p150_p10, %p146_p7 }
  0x25   :  { %154 = shalt.err (!%p151_p11)
}
  0x26   :  { %s155_s11 = scalar_lea.vmem %s34_s24, 512  ;;  %p160_p13 = scmp.lt.s32.totalorder %s34_s24, %s34_s24 }
  0x27   :  { %p156_p12 = scmp.ne.s32.totalorder %s34_s24, %s155_s11  ;;  %p161_p0 = scmp.lt.s32.totalorder %s155_s11, %s155_s11 }
  0x29   :  { %p162_p1 = por %p161_p0, %p160_p13 }
  0x2b   :  { %p163_p2 = pnand %p162_p1, %p156_p12 }
  0x2d   :  { %166 = shalt.err (!%p163_p2)
}
  0x2e   :  { %s197_s12 = smov 128   ;;  %s198_s13 = smov 8  }
  0x2f   :  { %39 = dma.hbm_to_vmem [thread:$0]  %s32_s30, 512, %s34_s24, [#allocation6], %s197_s12, %s197_s12, %s198_s13  }
  0x30   :  { %191 = dma.done.wait [#allocation6], 512  }
  0x31   :  { %192 = vsyncadd [#allocation6], 4294966784  ;;  %s122_s15 = sshll.u32 %s274_s1, 2  ;;  %s55_s16 = sld [smem:[#allocation3]]  ;;  %v63_v4 = vld [vmem:[%s276_s3] sm:$0xff]  ;;  %v123_v5 = vld [vmem:[%s276_s3 + $0x8] sm:$0xff] }
  0x32   :  { %v59_v0 = vstv %s122_s15  ;;  %s121_s17 = sld [smem:[#allocation3 + $0x1]]  ;;  %v76_v7 = vld [vmem:[#allocation5] sm:$0xff]  ;;  %v77_v9 = vld [vmem:[#allocation5 + $0x8] sm:$0xff]  ;;  %v78_v10 = vld [vmem:[#allocation5 + $0x10] sm:$0xff]  ;;  %s127_s0 = sshll.u32 %s274_s1, 9 }
  0x33   :  { %v60_v1 = vadd.s32 1, %v59_v0  ;;  %v61_v2 = vadd.s32 2, %v59_v0  ;;  %v62_v3 = vadd.s32 3, %v59_v0  ;;  %v79_v11 = vld [vmem:[#allocation5 + $0x18] sm:$0xff]  ;;  %s199_s24 = smov [#allocation8]   ;;  %s100_s1 = scalar_lea.hbm %s277_s4, %s127_s0 }
  0x34   :  { %s101_s25 = sshll.u32 %s199_s24, 4  ;;  %s102_s25 = int_to_ptr.vmem [resolvable:$true] %s101_s25 }
  0x35   :  { %s167_s27 = scalar_lea.vmem %s102_s25, 512  ;;  %p172_p4 = scmp.lt.s32.totalorder %s102_s25, %s102_s25 }
  0x36   :  { %p168_p3 = scmp.ne.s32.totalorder %s102_s25, %s167_s27  ;;  %p173_p5 = scmp.lt.s32.totalorder %s167_s27, %s167_s27 }
  0x37   :  { %v66_v6 = vstv %s55_s16 }
  0x38   :  { %vm67_vm0 = vcmp.lt.s32.totalorder %v59_v0, %v66_v6  ;;  %v71_v8 = vstv %s121_s17  ;;  %vm68_vm1 = vcmp.lt.s32.totalorder %v60_v1, %v66_v6  ;;  %vm69_vm2 = vcmp.lt.s32.totalorder %v61_v2, %v66_v6  ;;  %p174_p6 = por %p173_p5, %p172_p4 }
  0x39   :  { %vm72_vm3 = vcmp.ge.s32.totalorder %v59_v0, %v71_v8  ;;  %vm73_vm4 = vcmp.ge.s32.totalorder %v60_v1, %v71_v8  ;;  %vm74_vm5 = vcmp.ge.s32.totalorder %v61_v2, %v71_v8  ;;  %vm70_vm6 = vcmp.lt.s32.totalorder %v62_v3, %v66_v6 }
  0x3a   :  { %v80_v12 = vsel %vm72_vm3, %v123_v5, %v76_v7  ;;  %v81_v13 = vsel %vm73_vm4, %v123_v5, %v77_v9  ;;  %v82_v14 = vsel %vm74_vm5, %v123_v5, %v78_v10  ;;  %vm75_vm7 = vcmp.ge.s32.totalorder %v62_v3, %v71_v8  ;;  %p175_p7 = pnand %p174_p6, %p168_p3 }
  0x3b   :  { %v84_v15 = vsel %vm67_vm0, %v63_v4, %v80_v12  ;;  %v85_v16 = vsel %vm68_vm1, %v63_v4, %v81_v13  ;;  %v86_v17 = vsel %vm69_vm2, %v63_v4, %v82_v14  ;;  %v83_v18 = vsel %vm75_vm7, %v123_v5, %v79_v11 }
  0x3c   :  { %88 = vst [vmem:[#allocation8] sm:$0xff] %v84_v15  ;;  %89 = vst [vmem:[#allocation8 + $0x8] sm:$0xff] %v85_v16  ;;  %v87_v19 = vsel %vm70_vm6, %v63_v4, %v83_v18 }
  0x3d   :  { %90 = vst [vmem:[#allocation8 + $0x10] sm:$0xff] %v86_v17  ;;  %91 = vst [vmem:[#allocation8 + $0x18] sm:$0xff] %v87_v19 }
  0x3e   :  { %178 = shalt.err (!%p175_p7)
}
  0x3f   :  { %s179_s28 = scalar_lea.hbm %s100_s1, 512  ;;  %s181_s5 = scalar_lea.hbm %s277_s4, 1024 }
  0x40   :  { %p180_p8 = scmp.ne.s32.totalorder %s100_s1, %s179_s28  ;;  %p182_p9 = scmp.lt.s32.totalorder %s100_s1, %s277_s4 }
  0x41   :  { %p183_p10 = scmp.lt.s32.totalorder %s181_s5, %s179_s28 }
  0x43   :  { %p184_p11 = por %p183_p10, %p182_p9 }
  0x45   :  { %p185_p12 = pnand %p184_p11, %p180_p8 }
  0x47   :  { %188 = shalt.err (!%p185_p12)
}
  0x48   :  { %107 = dma.vmem_to_hbm [thread:$0]  %s102_s25, 512, %s100_s1, [#allocation7], %s197_s12, %s197_s12, %s198_s13  }
  0x49   :  { %193 = dma.done.wait [#allocation7], 512  }
  0x4a   :  { %194 = vsyncadd [#allocation7], 4294966784 }
  0x4b   :  { %111 = vsyncpa [#allocation6], 1 }
  0x4c   :  { %112 = vsyncpa [#allocation7], 1 }

</bundles_post_ra>
